<compile_context>
chip_gen: v7x
topology: tpu7x:2x2x1
jax: 0.10.0
libtpu: 0.0.40
codegen_flags: <defaults>
</compile_context>

<pallas_src>
import functools

import numpy as np
import jax
import jax.numpy as jnp
from jax.experimental import pallas as pl
from jax.experimental.pallas import tpu as pltpu

_MB = 1024 * 1024


# ----------------------------------------------------------------------------
# Gaussian kernel construction (replacement for cv2.getGaussianKernel)
# ----------------------------------------------------------------------------
def compute_kernel(sigma):
    """kernel_size = int(sigma*6+1), forced odd; cv2.getGaussianKernel formula."""
    ksize = int(sigma * 6 + 1)
    ksize = ksize if ksize % 2 == 1 else ksize - 1
    ksize = max(ksize, 1)
    xs = np.arange(ksize, dtype=np.float64) - (ksize - 1) / 2.0
    k = np.exp(-(xs ** 2) / (2.0 * sigma * sigma))
    k = k / k.sum()
    return k.astype(np.float32)          # (ksize,)


def _round_up(x, m):
    return ((x + m - 1) // m) * m


def _vmem_budget_and_limit():
    """Generation-aware per-step VMEM working-set budget + scoped-VMEM limit."""
    try:
        phys = int(pltpu.get_tpu_info().vmem_capacity_bytes)
    except Exception:
        phys = 0
    if phys >= 128 * _MB:            # v5e / v6e: 128 MiB physical VMEM
        return 32 * _MB, 64 * _MB
    if phys > 0:                     # v7x: 64 MiB physical per TensorCore
        return 14 * _MB, 40 * _MB
    return 12 * _MB, 32 * _MB        # unknown backend: conservative defaults


def _choose_row_tile(H, Win, Wo, HB, budget):
    """Row tile RT: multiple of HB, working set <= budget, even block count."""
    # Per output row: 2*Win (input dbl-buf) + 2*Wo (output dbl-buf)
    #               + Win (cat scratch)     + Win (vertical-result scratch) floats.
    bytes_per_row = 4 * (4 * Win + 2 * Wo)
    fixed = 4 * (3 * HB * Win)            # halo dbl-buf + cat's extra halo rows
    avail = max(budget - fixed, bytes_per_row * HB)
    rt = (avail // bytes_per_row) // HB * HB
    cap = (1024 // HB) * HB
    rt = int(max(HB, min(rt, cap, _round_up(H, HB))))
    # Prefer an even number of row blocks so a 2-TensorCore chip (v7x) splits
    # the "parallel" grid axis evenly.
    n = -(-H // rt)
    if n > 1 and n % 2 == 1:
        rt_even = _round_up(-(-H // (n + 1)), HB)
        if rt_even >= HB:
            rt = rt_even
    return int(rt)


# ----------------------------------------------------------------------------
# Fused separable blur kernel: vertical conv -> VMEM scratch -> horizontal conv
# ----------------------------------------------------------------------------
def _make_blur_kernel(taps, RT, HB, Wo):
    ksize = len(taps)
    pad = (ksize - 1) // 2
    symmetric = all(taps[t] == taps[ksize - 1 - t] for t in range(ksize))

    def kern(x_ref, halo_ref, o_ref, cat_ref, v_ref):
        # Stage row strip + halo contiguously in VMEM so both 1-D convs read
        # static-offset slices of a single ref (no value relayouts).
        cat_ref[0:RT, :] = x_ref[...]
        cat_ref[RT:RT + HB, :] = halo_ref[...]

        # Pass 1: vertical 1-D conv (sublane-offset ref slices), paired taps.
        if symmetric and ksize > 1:
            acc = taps[pad] * cat_ref[pad:pad + RT, :]
            for t in range(pad):
                acc = acc + taps[t] * (cat_ref[t:t + RT, :]
                                       + cat_ref[ksize - 1 - t:ksize - 1 - t + RT, :])
        else:
            acc = taps[0] * cat_ref[0:RT, :]
            for t in range(1, ksize):
                acc = acc + taps[t] * cat_ref[t:t + RT, :]
        v_ref[...] = acc

        # Pass 2: horizontal 1-D conv (lane-offset ref slices), paired taps.
        if symmetric and ksize > 1:
            out = taps[pad] * v_ref[:, pad:pad + Wo]
            for t in range(pad):
                out = out + taps[t] * (v_ref[:, t:t + Wo]
                                       + v_ref[:, ksize - 1 - t:ksize - 1 - t + Wo])
        else:
            out = taps[0] * v_ref[:, 0:Wo]
            for t in range(1, ksize):
                out = out + taps[t] * v_ref[:, t:t + Wo]
        o_ref[...] = out

    return kern


def _halo_index_map(ratio):
    def index_map(i):
        return ((i + 1) * ratio, 0)
    return index_map


@functools.lru_cache(maxsize=None)
def _build_blur(H, W, taps):
    """Build (and cache) an UN-jitted separable-blur fn for one shape + taps."""
    ksize = len(taps)
    pad = (ksize - 1) // 2
    if ksize == 1:
        return lambda x2d: x2d.astype(jnp.float32)
    if pad >= H or pad >= W:
        # nn.ReflectionPad2d requires pad < dim; fail loudly instead of OOB reads.
        raise ValueError(f"reflection pad {pad} too large for image ({H}, {W})")

    budget, vmem_limit = _vmem_budget_and_limit()

    Wo = _round_up(W, 128)                       # lane-dense output width
    Win = _round_up(Wo + 2 * pad, 128)           # padded input width >= Wo + 2*pad
    HB = _round_up(max(2 * pad, 8), 8)           # halo rows: >= 2*pad, multiple of 8
    RT = _choose_row_tile(H, Win, Wo, HB, budget)   # row tile, multiple of HB
    nrt = -(-H // RT)
    Hr = nrt * RT                                # tiled output height (>= H)
    Hin = Hr + HB                                # padded input height (extra halo)
    ratio = RT // HB

    blur_call = pl.pallas_call(
        _make_blur_kernel(taps, RT, HB, Wo),
        grid=(nrt,),
        in_specs=[
            pl.BlockSpec((RT, Win), lambda i: (i, 0)),            # main row strip
            pl.BlockSpec((HB, Win), _halo_index_map(ratio)),      # halo rows below
        ],
        out_specs=pl.BlockSpec((RT, Wo), lambda i: (i, 0)),
        out_shape=jax.ShapeDtypeStruct((Hr, Wo), jnp.float32),
        scratch_shapes=[
            pltpu.VMEM((RT + HB, Win), jnp.float32),   # strip + halo staging
            pltpu.VMEM((RT, Win), jnp.float32),        # vertical-conv result (f32!)
        ],
        compiler_params=pltpu.CompilerParams(
            dimension_semantics=("parallel",),
            vmem_limit_bytes=vmem_limit),
    )

    def run(x2d):
        x = x2d.astype(jnp.float32)
        # One reflection pad (PyTorch ReflectionPad2d semantics, edge excluded)
        # plus one zero pad to the tiled, lane-dense shape; both live under the
        # caller's jit so XLA fuses them into a single traversal.  Rows/cols
        # outside [0:H, 0:W] of the result are garbage and cropped below.
        xp = jnp.pad(x, ((pad, pad), (pad, pad)), mode="reflect")
        xp = jnp.pad(xp, ((0, Hin - (H + 2 * pad)), (0, Win - (W + 2 * pad))))
        y = blur_call(xp, xp)          # same padded array feeds main + halo specs
        return y[:H, :W]

    return run


@functools.lru_cache(maxsize=None)
def _build_blur_jit(H, W, taps):
    return jax.jit(_build_blur(H, W, taps))


def pallas_gaussian_blur_2d(x2d, kernel_1d):
    """Separable reflection-padded Gaussian blur of a 2-D image (Pallas)."""
    H, W = x2d.shape
    taps = tuple(float(v) for v in np.asarray(kernel_1d).reshape(-1))
    return _build_blur_jit(int(H), int(W), taps)(x2d)


def gaussian_blur_nchw(img, kernel_1d):
    """img: (1, 1, H, W) -> (1, 1, H, W); matches GaussianBlurNet_ forward."""
    return pallas_gaussian_blur_2d(img[0, 0], kernel_1d)[None, None]


# ----------------------------------------------------------------------------
# Glue ops (plain JAX, fused under jit with the adjacent blur where possible):
# bilinear x2 upsample (align_corners=False) and stride-2 "1x1 conv" downsample.
# ----------------------------------------------------------------------------
def _upsample2x_rows(x):
    # out[2i]   = 0.25*x[i-1] + 0.75*x[i]   (x[-1] := x[0],  PyTorch src clamp)
    # out[2i+1] = 0.75*x[i]   + 0.25*x[i+1] (x[H]  := x[H-1])
    prev = jnp.concatenate([x[:1, :], x[:-1, :]], axis=0)
    nxt = jnp.concatenate([x[1:, :], x[-1:, :]], axis=0)
    even = 0.25 * prev + 0.75 * x
    odd = 0.75 * x + 0.25 * nxt
    H, W = x.shape
    return jnp.stack([even, odd], axis=1).reshape(2 * H, W)


def _upsample2x_cols(x):
    prev = jnp.concatenate([x[:, :1], x[:, :-1]], axis=1)
    nxt = jnp.concatenate([x[:, 1:], x[:, -1:]], axis=1)
    even = 0.25 * prev + 0.75 * x
    odd = 0.75 * x + 0.25 * nxt
    H, W = x.shape
    return jnp.stack([even, odd], axis=2).reshape(H, 2 * W)


def bilinear_upsample_x2(img):
    """(1,1,H,W) -> (1,1,2H,2W); F.interpolate bilinear, align_corners=False."""
    x = img[0, 0].astype(jnp.float32)
    return _upsample2x_cols(_upsample2x_rows(x))[None, None]


def downsample_stride2(img):
    """F.conv2d(x, weight=[[[[1.]]]], stride=2)  ==  x[:, :, ::2, ::2]."""
    return img[:, :, ::2, ::2]


# ----------------------------------------------------------------------------
# Preprocess: anti-alias blur (sigma=0.5) + bilinear x2 upsample, one jit.
# ----------------------------------------------------------------------------
@functools.lru_cache(maxsize=None)
def _build_preprocess(H, W):
    taps = tuple(float(v) for v in compute_kernel(0.5))
    blur = _build_blur(H, W, taps)

    @jax.jit
    def run(x2d):
        y = blur(x2d.astype(jnp.float32))
        return _upsample2x_cols(_upsample2x_rows(y))[None, None]

    return run


def preprocess(img_2d):
    """Anti-alias blur (sigma=0.5) + bilinear x2 upsample. img_2d: (H, W)."""
    img = jnp.asarray(img_2d, jnp.float32)
    H, W = img.shape
    return _build_preprocess(int(H), int(W))(img)


# ----------------------------------------------------------------------------
# Pyramid network
# ----------------------------------------------------------------------------
class GaussianPyramidNet:
    def __init__(self, img, S, sigma0, O):
        self.img = img          # (H, W) grayscale image
        self.S = S
        self.Sp3 = S + 3
        self.sigma0 = sigma0
        self.O = O

    def forward(self):
        # TODO(synk): fuse the S+2 blur levels of an octave into a single
        # pallas_call (keep the row strip resident in VMEM across levels,
        # chaining taps level-to-level) to cut HBM traffic and launch overhead
        # by another ~(S+2)x per octave; batch the tiny deep-octave levels.
        pyramid = [preprocess(self.img)]
        k = np.power(2.0, 1.0 / self.S)
        sigma = []
        for s in range(1, self.S + 3):
            pre = self.sigma0 * k ** (s - 1)
            now = pre * k
            sigma.append((now ** 2 - pre ** 2) ** 0.5)
        for o in range(self.O + 1):
            if o > 0:
                # first image of a new octave: stride-2 downsample of the
                # third-from-last image of the previous octave
                pyramid.append(downsample_stride2(pyramid[o * self.Sp3 - 3]))
            for s in range(1, self.S + 3):
                kern = compute_kernel(sigma[s - 1])
                pyramid.append(gaussian_blur_nchw(pyramid[o * self.Sp3 + s - 1], kern))
        return pyramid


# ----------------------------------------------------------------------------
# Pure-JAX reference blur (identical padding order / tap order) for sanity check
# ----------------------------------------------------------------------------
def _ref_blur_2d(x, kernel_1d):
    kernel_1d = jnp.asarray(kernel_1d, jnp.float32).reshape(-1)
    ksize = int(kernel_1d.shape[0])
    pad = (ksize - 1) // 2
    H, W = x.shape
    xp = jnp.pad(x, ((pad, pad), (0, 0)), mode="reflect")
    acc = kernel_1d[0] * xp[0:H, :]
    for t in range(1, ksize):
        acc = acc + kernel_1d[t] * xp[t:t + H, :]
    yp = jnp.pad(acc, ((0, 0), (pad, pad)), mode="reflect")
    out = kernel_1d[0] * yp[:, 0:W]
    for t in range(1, ksize):
        out = out + kernel_1d[t] * yp[:, t:t + W]
    return out


if __name__ == "__main__":
    key = jax.random.PRNGKey(0)
    k1, k2 = jax.random.split(key)
    img = jax.random.uniform(k1, (16, 16), dtype=jnp.float32) * 255.0

    # --- sanity: Pallas blur vs. pure-JAX reference (square + non-square) ---
    for shape, sig in (((16, 16), 1.6), ((24, 40), 2.0), ((16, 16), 0.5)):
        x = jax.random.uniform(k2, shape, dtype=jnp.float32) * 255.0
        kc = compute_kernel(sig)
        got = pallas_gaussian_blur_2d(x, kc)
        want = _ref_blur_2d(x, kc)
        np.testing.assert_allclose(np.asarray(got), np.asarray(want),
                                   rtol=1e-4, atol=1e-3)

    # --- full pyramid ---
    net = GaussianPyramidNet(img, S=3, sigma0=1.6, O=1)
    pyramid = net.forward()
    for p in pyramid:
        jax.block_until_ready(p)

    assert len(pyramid) == (net.O + 1) * (net.S + 3)
    assert pyramid[0].shape == (1, 1, 32, 32)
    assert pyramid[net.Sp3].shape == (1, 1, 16, 16)
    print("KERNEL_OK")
</pallas_src>

<mosaic_0001>
module attributes {stable_mosaic.version = 11 : i64} {
  func.func @kern(%arg0: i32, %arg1: memref<16x256xf32, #tpu.memory_space<vmem>>, %arg2: memref<8x256xf32, #tpu.memory_space<vmem>>, %arg3: memref<16x128xf32, #tpu.memory_space<vmem>>, %arg4: memref<24x256xf32, #tpu.memory_space<vmem>>, %arg5: memref<16x256xf32, #tpu.memory_space<vmem>>) attributes {dimension_semantics = [#tpu.dimension_semantics<parallel>], iteration_bounds = array<i64: 1>, scalar_prefetch = 0 : i64, scratch_operands = 2 : i64, tpu.core_type = #tpu.core_type<tc>, window_params = [{transform_indices = @transform_0, window_bounds = array<i64: 16, 256>}, {transform_indices = @transform_1, window_bounds = array<i64: 8, 256>}, {transform_indices = @transform_2, window_bounds = array<i64: 16, 128>}]} {
    %c0 = arith.constant 0 : index
    %c0_0 = arith.constant 0 : index
    %0 = vector.load %arg1[%c0, %c0_0] : memref<16x256xf32, #tpu.memory_space<vmem>>, vector<16x256xf32>
    %c0_1 = arith.constant 0 : index
    %c0_2 = arith.constant 0 : index
    %1 = vector.load %arg4[%c0_1, %c0_2] : memref<24x256xf32, #tpu.memory_space<vmem>>, vector<16x256xf32>
    tpu.vector_store %arg4[%c0_1, %c0_2], %0 {strides = array<i32>} : memref<24x256xf32, #tpu.memory_space<vmem>>, vector<16x256xf32>,
    %c0_3 = arith.constant 0 : index
    %c0_4 = arith.constant 0 : index
    %2 = vector.load %arg2[%c0_3, %c0_4] : memref<8x256xf32, #tpu.memory_space<vmem>>, vector<8x256xf32>
    %c16 = arith.constant 16 : index
    %c0_5 = arith.constant 0 : index
    %3 = vector.load %arg4[%c16, %c0_5] : memref<24x256xf32, #tpu.memory_space<vmem>>, vector<8x256xf32>
    tpu.vector_store %arg4[%c16, %c0_5], %2 {strides = array<i32>} : memref<24x256xf32, #tpu.memory_space<vmem>>, vector<8x256xf32>,
    %c4 = arith.constant 4 : index
    %c0_6 = arith.constant 0 : index
    %4 = vector.load %arg4[%c4, %c0_6] : memref<24x256xf32, #tpu.memory_space<vmem>>, vector<16x256xf32>
    %cst = arith.constant 0.250404477 : f32
    %5 = vector.broadcast %cst : f32 to vector<16x256xf32>
    %6 = arith.mulf %5, %4 : vector<16x256xf32>
    %c0_7 = arith.constant 0 : index
    %c0_8 = arith.constant 0 : index
    %7 = vector.load %arg4[%c0_7, %c0_8] : memref<24x256xf32, #tpu.memory_space<vmem>>, vector<16x256xf32>
    %c8 = arith.constant 8 : index
    %c0_9 = arith.constant 0 : index
    %8 = vector.load %arg4[%c8, %c0_9] : memref<24x256xf32, #tpu.memory_space<vmem>>, vector<16x256xf32>
    %9 = arith.addf %7, %8 : vector<16x256xf32>
    %cst_10 = arith.constant 0.0110020041 : f32
    %10 = vector.broadcast %cst_10 : f32 to vector<16x256xf32>
    %11 = arith.mulf %10, %9 : vector<16x256xf32>
    %12 = arith.addf %6, %11 : vector<16x256xf32>
    %c1 = arith.constant 1 : index
    %c0_11 = arith.constant 0 : index
    %13 = vector.load %arg4[%c1, %c0_11] : memref<24x256xf32, #tpu.memory_space<vmem>>, vector<16x256xf32>
    %c7 = arith.constant 7 : index
    %c0_12 = arith.constant 0 : index
    %14 = vector.load %arg4[%c7, %c0_12] : memref<24x256xf32, #tpu.memory_space<vmem>>, vector<16x256xf32>
    %15 = arith.addf %13, %14 : vector<16x256xf32>
    %cst_13 = arith.constant 0.043175146 : f32
    %16 = vector.broadcast %cst_13 : f32 to vector<16x256xf32>
    %17 = arith.mulf %16, %15 : vector<16x256xf32>
    %18 = arith.addf %12, %17 : vector<16x256xf32>
    %c2 = arith.constant 2 : index
    %c0_14 = arith.constant 0 : index
    %19 = vector.load %arg4[%c2, %c0_14] : memref<24x256xf32, #tpu.memory_space<vmem>>, vector<16x256xf32>
    %c6 = arith.constant 6 : index
    %c0_15 = arith.constant 0 : index
    %20 = vector.load %arg4[%c6, %c0_15] : memref<24x256xf32, #tpu.memory_space<vmem>>, vector<16x256xf32>
    %21 = arith.addf %19, %20 : vector<16x256xf32>
    %cst_16 = arith.constant 0.114643522 : f32
    %22 = vector.broadcast %cst_16 : f32 to vector<16x256xf32>
    %23 = arith.mulf %22, %21 : vector<16x256xf32>
    %24 = arith.addf %18, %23 : vector<16x256xf32>
    %c3 = arith.constant 3 : index
    %c0_17 = arith.constant 0 : index
    %25 = vector.load %arg4[%c3, %c0_17] : memref<24x256xf32, #tpu.memory_space<vmem>>, vector<16x256xf32>
    %c5 = arith.constant 5 : index
    %c0_18 = arith.constant 0 : index
    %26 = vector.load %arg4[%c5, %c0_18] : memref<24x256xf32, #tpu.memory_space<vmem>>, vector<16x256xf32>
    %27 = arith.addf %25, %26 : vector<16x256xf32>
    %cst_19 = arith.constant 0.205977097 : f32
    %28 = vector.broadcast %cst_19 : f32 to vector<16x256xf32>
    %29 = arith.mulf %28, %27 : vector<16x256xf32>
    %30 = arith.addf %24, %29 : vector<16x256xf32>
    %c0_20 = arith.constant 0 : index
    %c0_21 = arith.constant 0 : index
    %31 = vector.load %arg5[%c0_20, %c0_21] : memref<16x256xf32, #tpu.memory_space<vmem>>, vector<16x256xf32>
    tpu.vector_store %arg5[%c0_20, %c0_21], %30 {strides = array<i32>} : memref<16x256xf32, #tpu.memory_space<vmem>>, vector<16x256xf32>,
    %c0_22 = arith.constant 0 : index
    %c4_23 = arith.constant 4 : index
    %32 = vector.load %arg5[%c0_22, %c4_23] : memref<16x256xf32, #tpu.memory_space<vmem>>, vector<16x128xf32>
    %cst_24 = arith.constant 0.250404477 : f32
    %33 = vector.broadcast %cst_24 : f32 to vector<16x128xf32>
    %34 = arith.mulf %33, %32 : vector<16x128xf32>
    %c0_25 = arith.constant 0 : index
    %c0_26 = arith.constant 0 : index
    %35 = vector.load %arg5[%c0_25, %c0_26] : memref<16x256xf32, #tpu.memory_space<vmem>>, vector<16x128xf32>
    %c0_27 = arith.constant 0 : index
    %c8_28 = arith.constant 8 : index
    %36 = vector.load %arg5[%c0_27, %c8_28] : memref<16x256xf32, #tpu.memory_space<vmem>>, vector<16x128xf32>
    %37 = arith.addf %35, %36 : vector<16x128xf32>
    %cst_29 = arith.constant 0.0110020041 : f32
    %38 = vector.broadcast %cst_29 : f32 to vector<16x128xf32>
    %39 = arith.mulf %38, %37 : vector<16x128xf32>
    %40 = arith.addf %34, %39 : vector<16x128xf32>
    %c0_30 = arith.constant 0 : index
    %c1_31 = arith.constant 1 : index
    %41 = vector.load %arg5[%c0_30, %c1_31] : memref<16x256xf32, #tpu.memory_space<vmem>>, vector<16x128xf32>
    %c0_32 = arith.constant 0 : index
    %c7_33 = arith.constant 7 : index
    %42 = vector.load %arg5[%c0_32, %c7_33] : memref<16x256xf32, #tpu.memory_space<vmem>>, vector<16x128xf32>
    %43 = arith.addf %41, %42 : vector<16x128xf32>
    %cst_34 = arith.constant 0.043175146 : f32
    %44 = vector.broadcast %cst_34 : f32 to vector<16x128xf32>
    %45 = arith.mulf %44, %43 : vector<16x128xf32>
    %46 = arith.addf %40, %45 : vector<16x128xf32>
    %c0_35 = arith.constant 0 : index
    %c2_36 = arith.constant 2 : index
    %47 = vector.load %arg5[%c0_35, %c2_36] : memref<16x256xf32, #tpu.memory_space<vmem>>, vector<16x128xf32>
    %c0_37 = arith.constant 0 : index
    %c6_38 = arith.constant 6 : index
    %48 = vector.load %arg5[%c0_37, %c6_38] : memref<16x256xf32, #tpu.memory_space<vmem>>, vector<16x128xf32>
    %49 = arith.addf %47, %48 : vector<16x128xf32>
    %cst_39 = arith.constant 0.114643522 : f32
    %50 = vector.broadcast %cst_39 : f32 to vector<16x128xf32>
    %51 = arith.mulf %50, %49 : vector<16x128xf32>
    %52 = arith.addf %46, %51 : vector<16x128xf32>
    %c0_40 = arith.constant 0 : index
    %c3_41 = arith.constant 3 : index
    %53 = vector.load %arg5[%c0_40, %c3_41] : memref<16x256xf32, #tpu.memory_space<vmem>>, vector<16x128xf32>
    %c0_42 = arith.constant 0 : index
    %c5_43 = arith.constant 5 : index
    %54 = vector.load %arg5[%c0_42, %c5_43] : memref<16x256xf32, #tpu.memory_space<vmem>>, vector<16x128xf32>
    %55 = arith.addf %53, %54 : vector<16x128xf32>
    %cst_44 = arith.constant 0.205977097 : f32
    %56 = vector.broadcast %cst_44 : f32 to vector<16x128xf32>
    %57 = arith.mulf %56, %55 : vector<16x128xf32>
    %58 = arith.addf %52, %57 : vector<16x128xf32>
    %c0_45 = arith.constant 0 : index
    %c0_46 = arith.constant 0 : index
    %59 = vector.load %arg3[%c0_45, %c0_46] : memref<16x128xf32, #tpu.memory_space<vmem>>, vector<16x128xf32>
    tpu.vector_store %arg3[%c0_45, %c0_46], %58 {strides = array<i32>} : memref<16x128xf32, #tpu.memory_space<vmem>>, vector<16x128xf32>,
    return
  }
  func.func @transform_0(%arg0: i32) -> (i32, i32) {
    %c0_i32 = arith.constant 0 : i32
    %c0_i32_0 = arith.constant 0 : i32
    return %arg0, %c0_i32 : i32, i32
  }
  func.func @transform_1(%arg0: i32) -> (i32, i32) {
    %c1_i32 = arith.constant 1 : i32
    %0 = arith.addi %arg0, %c1_i32 : i32
    %c2_i32 = arith.constant 2 : i32
    %1 = arith.muli %0, %c2_i32 : i32
    %c0_i32 = arith.constant 0 : i32
    %c0_i32_0 = arith.constant 0 : i32
    return %1, %c0_i32 : i32, i32
  }
  func.func @transform_2(%arg0: i32) -> (i32, i32) {
    %c0_i32 = arith.constant 0 : i32
    %c0_i32_0 = arith.constant 0 : i32
    return %arg0, %c0_i32 : i32, i32
  }
}

</mosaic_0001>

<bundles_post_ra>
// kernel: run.1
= control target key start
LH: loop header
LB: loop body
LE: loop exit
PB: predicated region body
PF: predicated region fallthrough
CT: control target
= control target key end

     0   :  { %vm79_vm0 = vcmask 1043456   ;;  %vm112_vm1 = vcmask 1041408   ;;  %s800_s0 = inlined_call_operand.vmem [shape: f32[24,256], index: 0, kind: input, shape index: {}, may-alias: {0,1}]   ;;  %s801_s1 = inlined_call_operand.vmem [shape: f32[24,256], index: 1, kind: input, shape index: {}, may-alias: {0,1}]   ;;  %s802_s2 = inlined_call_operand.hbm [shape: f32[16,128], index: 2, kind: output, shape index: {}]  }
   0x1   :  { %v37_v0 = vld [vmem:[%s800_s0] sm:$0xff]  ;;  %v622_v1 = vld [vmem:[%s800_s0 + $0x10] sm:$0xff]  ;;  %v38_v5 = vld [vmem:[%s800_s0 + $0x8] sm:$0xff] }
   0x2   :  { %v553_v2 = vld [vmem:[%s801_s1 + $0x20] sm:$0xff]  ;;  %41 = vst [vmem:[#allocation2] sm:$0xff] %v37_v0  ;;  %v67_v3 = vadd.f32 %v622_v1, %v37_v0  ;;  %v635_v6 = vld [vmem:[%s800_s0 + $0x18] sm:$0xff]  ;;  %42 = vst [vmem:[#allocation2 + $0x8] sm:$0xff] %v38_v5  ;;  %v57_v12 = vmul.f32 0.25040448, %v622_v1 }
   0x3   :  { %47 = vst [vmem:[#allocation2 + $0x20] sm:$0xff] %v553_v2  ;;  %v69_v4 = vadd.f32 %v553_v2, %v622_v1  ;;  %v554_v7 = vld [vmem:[%s801_s1 + $0x28] sm:$0xff]  ;;  %v68_v10 = vadd.f32 %v635_v6, %v38_v5 }
   0x4   :  { %v640_v8 = vmul.f32 0.011002004, %v67_v3  ;;  %48 = vst [vmem:[#allocation2 + $0x28] sm:$0xff] %v554_v7  ;;  %v70_v11 = vadd.f32 %v554_v7, %v635_v6 }
   0x5   :  { %v73_v9 = vmul.f32 0.011002004, %v69_v4 }
   0x6   :  { %v80_v13 = vrot.slane %v640_v8, 4 }
   0x7   :  { %v82_v14 = vrot.slane %v73_v9, 4 }
   0x8   :  { %7 = vsyncpa [#allocation5], 0  ;;  %v114_v15 = vrot.slane %v622_v1, 6  ;;  %v183_v16 = vrot.slane %v622_v1, 4  ;;  %vm250_vm2 = vcmask 1045504   ;;  %v252_v18 = vrot.slane %v622_v1, 2 }
   0x9   :  { %v648_v17 = vmul.f32 0.011002004, %v68_v10  ;;  %v652_v19 = vmul.f32 0.25040448, %v635_v6  ;;  %v117_v20 = vrot.slane %v635_v6, 6  ;;  %v186_v21 = vrot.slane %v635_v6, 4 }
   0xa   :  { %v53_v22 = vld [vmem:[#allocation2 + $0x20] sm:$0xf]  ;;  %v83_v23 = vsel %vm79_vm0, %v80_v13, %v82_v14  ;;  %vm147_vm3 = vcmask 1042432   ;;  %v659_v25 = vmul.f32 0.011002004, %v70_v11  ;;  %v255_v33 = vrot.slane %v635_v6, 2 }
   0xb   :  { %v100_v24 = vld [vmem:[#allocation2 + $0x20] sm:$0x1]  ;;  %v59_v26 = vmul.f32 0.25040448, %v53_v22  ;;  %v102_v27 = vld [vmem:[#allocation2] sm:$0x80]  ;;  %v94_v34 = vadd.f32 %v83_v23, %v57_v12 }
   0xc   :  { %v104_v28 = vld [vmem:[#allocation2 + $0x20] sm:$0x7f]  ;;  %v113_v30 = vrot.slane %v102_v27, 6  ;;  %v81_v32 = vrot.slane %v648_v17, 4  ;;  %vm285_vm4 = vcmask 1040384   ;;  %s590_s0 = smov 120  }
   0xd   :  { %v98_v29 = vld [vmem:[#allocation2] sm:$0xfe]  ;;  %v119_v31 = vrot.slane %v104_v28, 6  ;;  %v96_v35 = vadd.f32 %v82_v14, %v59_v26  ;;  %v54_v22 = vld [vmem:[#allocation2 + $0x28] sm:$0xf]  ;;  %s591_s1 = smov 122  }
   0xe   :  { %v170_v36 = vld [vmem:[#allocation2] sm:$0xfc]  ;;  %v115_v39 = vsel %vm112_vm1, %v113_v30, %v114_v15  ;;  %v172_v42 = vld [vmem:[#allocation2 + $0x20] sm:$0x3]  ;;  %v103_v28 = vld [vmem:[#allocation2 + $0x8] sm:$0x80] }
   0xf   :  { %v174_v37 = vld [vmem:[#allocation2] sm:$0xc0]  ;;  %v176_v38 = vld [vmem:[#allocation2 + $0x20] sm:$0x3f]  ;;  %v120_v40 = vsel %vm112_vm1, %v114_v15, %v119_v31  ;;  %v133_v41 = vadd.f32 %v119_v31, %v100_v24  ;;  %v129_v45 = vadd.f32 %v115_v39, %v98_v29  ;;  %v105_v39 = vld [vmem:[#allocation2 + $0x28] sm:$0x7f] }
  0x10   :  { %v182_v43 = vrot.slane %v174_v37, 4  ;;  %v242_v44 = vld [vmem:[#allocation2] sm:$0xe0]  ;;  %v131_v46 = vadd.f32 %v120_v40, %v622_v1  ;;  %v188_v47 = vrot.slane %v176_v38, 4  ;;  %v244_v48 = vld [vmem:[#allocation2 + $0x20] sm:$0x1f] }
  0x11   :  { %v251_v49 = vrot.slane %v242_v44, 2  ;;  %v49_v50 = vld [vmem:[#allocation2] sm:$0xf0]  ;;  %v139_v51 = vmul.f32 0.043175146, %v133_v41  ;;  %v257_v53 = vrot.slane %v244_v48, 2 }
  0x12   :  { %v184_v52 = vsel %vm79_vm0, %v182_v43, %v183_v16  ;;  %v55_v54 = vmul.f32 0.25040448, %v49_v50  ;;  %v135_v55 = vmul.f32 0.043175146, %v129_v45  ;;  %v137_v56 = vmul.f32 0.043175146, %v131_v46 }
  0x13   :  { %v189_v57 = vsel %vm79_vm0, %v183_v16, %v188_v47  ;;  %v198_v58 = vadd.f32 %v184_v52, %v170_v36  ;;  %v238_v59 = vld [vmem:[#allocation2] sm:$0xf8]  ;;  %v154_v60 = vrot.slane %v139_v51, 5  ;;  %v202_v62 = vadd.f32 %v188_v47, %v172_v42  ;;  %v240_v63 = vld [vmem:[#allocation2 + $0x20] sm:$0x7]  ;;  %s592_s21 = smov 124  }
  0x14   :  { %v200_v61 = vadd.f32 %v189_v57, %v622_v1  ;;  %v253_v0 = vsel %vm250_vm2, %v251_v49, %v252_v18  ;;  %v148_v2 = vrot.slane %v135_v55, 5  ;;  %v150_v3 = vrot.slane %v137_v56, 5  ;;  %v175_v42 = vld [vmem:[#allocation2 + $0x8] sm:$0xc0]  ;;  %v101_v45 = vld [vmem:[#allocation2 + $0x28] sm:$0x1] }
  0x15   :  { %v204_v4 = vmul.f32 0.11464352, %v198_v58  ;;  %v258_v5 = vsel %vm250_vm2, %v252_v18, %v257_v53  ;;  %v208_v9 = vmul.f32 0.11464352, %v202_v62  ;;  %v267_v10 = vadd.f32 %v253_v0, %v238_v59  ;;  %v99_v48 = vld [vmem:[#allocation2 + $0x8] sm:$0xfe] }
  0x16   :  { %v206_v7 = vmul.f32 0.11464352, %v200_v61  ;;  %v269_v11 = vadd.f32 %v258_v5, %v622_v1  ;;  %v151_v12 = vsel %vm147_vm3, %v148_v2, %v150_v3  ;;  %v155_v14 = vsel %vm147_vm3, %v150_v3, %v154_v60  ;;  %v243_v0 = vld [vmem:[#allocation2 + $0x8] sm:$0xe0]  ;;  %s593_s22 = smov 126   ;;  %s594_s23 = smov 4  }
  0x17   :  { %v216_v15 = vrot.slane %v204_v4, 6  ;;  %v271_v16 = vadd.f32 %v257_v53, %v240_v63  ;;  %v166_v23 = vadd.f32 %v151_v12, %v94_v34  ;;  %v168_v24 = vadd.f32 %v155_v14, %v96_v35  ;;  %v177_v53 = vld [vmem:[#allocation2 + $0x28] sm:$0x3f]  ;;  %s595_s24 = smov 3   ;;  %s596_s25 = smov 2  }
  0x18   :  { %v218_v26 = vrot.slane %v206_v7, 6  ;;  %v222_v27 = vrot.slane %v208_v9, 6  ;;  %v273_v29 = vmul.f32 0.2059771, %v267_v10  ;;  %v275_v30 = vmul.f32 0.2059771, %v269_v11 }
  0x19   :  { %v277_v18 = vmul.f32 0.2059771, %v271_v16  ;;  %v92_v31 = vadd.f32 %v80_v13, %v55_v54  ;;  %v60_v37 = vmul.f32 0.25040448, %v54_v22  ;;  %v84_v38 = vrot.slane %v659_v25, 4  ;;  %s597_s26 = smov 1  }
  0x1a   :  { %v219_v1 = vsel %vm112_vm1, %v216_v15, %v218_v26  ;;  %v223_v36 = vsel %vm112_vm1, %v218_v26, %v222_v27  ;;  %v286_v35 = vrot.slane %v273_v29, 7  ;;  %v288_v41 = vrot.slane %v275_v30, 7  ;;  %v173_v63 = vld [vmem:[#allocation2 + $0x28] sm:$0x3]  ;;  %v50_v22 = vld [vmem:[#allocation2 + $0x8] sm:$0xf0] }
  0x1b   :  { %v234_v40 = vadd.f32 %v219_v1, %v166_v23  ;;  %v236_v34 = vadd.f32 %v223_v36, %v168_v24  ;;  %v292_v43 = vrot.slane %v277_v18, 7  ;;  %v164_v44 = vadd.f32 %v148_v2, %v92_v31  ;;  %v245_v7 = vld [vmem:[#allocation2 + $0x28] sm:$0x1f]  ;;  %s598_s27 = smov [#allocation4]  }
  0x1c   :  { %v85_v8 = vsel %vm79_vm0, %v81_v32, %v84_v38  ;;  %v97_v13 = vadd.f32 %v84_v38, %v60_v37  ;;  %v289_v46 = vsel %vm285_vm4, %v286_v35, %v288_v41  ;;  %v116_v25 = vrot.slane %v103_v28, 6  ;;  %v241_v28 = vld [vmem:[#allocation2 + $0x28] sm:$0x7]  ;;  %v239_v37 = vld [vmem:[#allocation2 + $0x8] sm:$0xf8]  ;;  %s536_s28 = sshll.u32 %s598_s27, 4  ;;  %s537_s28 = int_to_ptr.vmem [resolvable:$true] %s536_s28 }
  0x1d   :  { %v95_v47 = vadd.f32 %v85_v8, %v652_v19  ;;  %v121_v49 = vrot.slane %v105_v39, 6  ;;  %v293_v50 = vsel %vm285_vm4, %v288_v41, %v292_v43  ;;  %v304_v51 = vadd.f32 %v289_v46, %v234_v40  ;;  %v171_v19 = vld [vmem:[#allocation2 + $0x8] sm:$0xfc]  ;;  %s566_s29 = scalar_lea.vmem %s537_s28, 256  ;;  %p571_p1 = scmp.lt.s32.totalorder %s537_s28, %s537_s28 }
  0x1e   :  { %v232_v52 = vadd.f32 %v216_v15, %v164_v44  ;;  %v185_v54 = vrot.slane %v175_v42, 4  ;;  %v306_v55 = vadd.f32 %v293_v50, %v236_v34  ;;  %v118_v56 = vsel %vm112_vm1, %v116_v25, %v117_v20  ;;  %p567_p0 = scmp.ne.s32.totalorder %s537_s28, %s566_s29  ;;  %p572_p2 = scmp.lt.s32.totalorder %s566_s29, %s566_s29 }
  0x1f   :  { %v122_v57 = vsel %vm112_vm1, %v117_v20, %v121_v49  ;;  %v134_v58 = vadd.f32 %v121_v49, %v101_v45  ;;  %v315_v59 = vrot.slane %v304_v51, 4  ;;  %v130_v61 = vadd.f32 %v118_v56, %v99_v48 }
  0x20   :  { %v302_v60 = vadd.f32 %v286_v35, %v232_v52  ;;  %v132_v62 = vadd.f32 %v122_v57, %v635_v6  ;;  %v320_v2 = vrot.slane %v306_v55, 4  ;;  %v187_v4 = vsel %vm79_vm0, %v185_v54, %v186_v21  ;;  %p573_p3 = por %p572_p2, %p571_p1 }
  0x21   :  { %v140_v3 = vmul.f32 0.043175146, %v134_v58  ;;  %v190_v5 = vrot.slane %v177_v53, 4  ;;  %v136_v10 = vmul.f32 0.043175146, %v130_v61  ;;  %v199_v11 = vadd.f32 %v187_v4, %v171_v19 }
  0x22   :  { %v314_v9 = vrot.slane %v302_v60, 4  ;;  %v138_v20 = vmul.f32 0.043175146, %v132_v62  ;;  %v696_v12 = vsel %vm79_vm0, %v315_v59, %v320_v2  ;;  %v259_v18 = vrot.slane %v245_v7, 2  ;;  %p574_p4 = pnand %p573_p3, %p567_p0 }
  0x23   :  { %v156_v14 = vrot.slane %v140_v3, 5  ;;  %v191_v15 = vsel %vm79_vm0, %v186_v21, %v190_v5  ;;  %v203_v16 = vadd.f32 %v190_v5, %v173_v63  ;;  %350 = vrot.lane.b32.xlu1 %v696_v12, %s590_s0  ;;  %v149_v24 = vrot.slane %v136_v10, 5 }
  0x24   :  { %v704_v23 = vsel %vm79_vm0, %v314_v9, %v315_v59  ;;  %v152_v26 = vrot.slane %v138_v20, 5  ;;  %v201_v27 = vadd.f32 %v191_v15, %v635_v6  ;;  %v205_v29 = vmul.f32 0.11464352, %v199_v11 }
  0x25   :  { %346 = vrot.lane.b32.xlu0 %v704_v23, %s590_s0  ;;  %v209_v30 = vmul.f32 0.11464352, %v203_v16  ;;  %v254_v21 = vrot.slane %v243_v0, 2  ;;  %v56_v38 = vmul.f32 0.25040448, %v50_v22  ;;  %v260_v43 = vsel %vm250_vm2, %v255_v33, %v259_v18 }
  0x26   :  { %v153_v31 = vsel %vm147_vm3, %v149_v24, %v152_v26  ;;  %v157_v1 = vsel %vm147_vm3, %v152_v26, %v156_v14  ;;  %v207_v36 = vmul.f32 0.11464352, %v201_v27  ;;  %v217_v34 = vrot.slane %v205_v29, 6 }
  0x27   :  { %v167_v39 = vadd.f32 %v153_v31, %v95_v47  ;;  %v169_v40 = vadd.f32 %v157_v1, %v97_v13  ;;  %v224_v35 = vrot.slane %v209_v30, 6  ;;  %v256_v42 = vsel %vm250_vm2, %v254_v21, %v255_v33 }
  0x28   :  { %v220_v41 = vrot.slane %v207_v36, 6  ;;  %v272_v44 = vadd.f32 %v259_v18, %v241_v28  ;;  %v268_v8 = vadd.f32 %v256_v42, %v239_v37  ;;  %v270_v45 = vadd.f32 %v260_v43, %v635_v6 }
  0x29   :  { %v93_v46 = vadd.f32 %v81_v32, %v56_v38  ;;  %vm354_vm5 = vcmask 982016   ;;  %vm383_vm6 = vcmask 998400   ;;  %vm429_vm7 = vcmask 1014784  }
  0x2a   :  { %v221_v13 = vsel %vm112_vm1, %v217_v34, %v220_v41  ;;  %v225_v47 = vsel %vm112_vm1, %v220_v41, %v224_v35  ;;  %v278_v48 = vmul.f32 0.2059771, %v272_v44  ;;  %v274_v25 = vmul.f32 0.2059771, %v268_v8 }
  0x2b   :  { %v276_v49 = vmul.f32 0.2059771, %v270_v45  ;;  %v235_v50 = vadd.f32 %v221_v13, %v167_v39  ;;  %v237_v51 = vadd.f32 %v225_v47, %v169_v40  ;;  %v165_v53 = vadd.f32 %v149_v24, %v93_v46 }
  0x2c   :  { %v294_v52 = vrot.slane %v278_v48, 7  ;;  %v287_v54 = vrot.slane %v274_v25, 7  ;;  %vm475_vm8 = vcmask 1031168   ;;  %vm410_vm9 = vcmask 23552  }
  0x2d   :  { %v290_v33 = vrot.slane %v276_v49, 7  ;;  %v233_v55 = vadd.f32 %v217_v34, %v165_v53  ;;  %vm456_vm10 = vcmask 15360   ;;  %vm502_vm11 = vcmask 7168  }
  0x2f   :  { %v291_v56 = vsel %vm285_vm4, %v287_v54, %v290_v33  ;;  %v295_v6 = vsel %vm285_vm4, %v290_v33, %v294_v52  ;;  %v303_v57 = vadd.f32 %v287_v54, %v233_v55 }
  0x30   :  { %v305_v17 = vadd.f32 %v291_v56, %v235_v50  ;;  %v307_v32 = vadd.f32 %v295_v6, %v237_v51 }
  0x31   :  { %v317_v59 = vrot.slane %v303_v57, 4 }
  0x32   :  { %v318_v58 = vrot.slane %v305_v17, 4  ;;  %v322_v19 = vrot.slane %v307_v32, 4 }
  0x34   :  { %v725_v60 = vsel %vm79_vm0, %v318_v58, %v322_v19  ;;  %v728_v61 = vsel %vm79_vm0, %v317_v59, %v318_v58  ;;  %v336_v58 = vmul.f32 0.25040448, %v704_v23 }
  0x35   :  { %352 = vrot.lane.b32.xlu1 %v725_v60, %s590_s0  ;;  %348 = vrot.lane.b32.xlu0 %v728_v61, %s590_s0 }
  0x39   :  { %377 = vrot.lane.b32.xlu1 %v728_v61, %s591_s1  ;;  %375 = vrot.lane.b32.xlu0 %v704_v23, %s591_s1 }
  0x3d   :  { %381 = vrot.lane.b32.xlu1 %v725_v60, %s591_s1  ;;  %379 = vrot.lane.b32.xlu0 %v696_v12, %s591_s1 }
  0x41   :  { %423 = vrot.lane.b32.xlu1 %v728_v61, %s592_s21  ;;  %421 = vrot.lane.b32.xlu0 %v704_v23, %s592_s21 }
  0x45   :  { %427 = vrot.lane.b32.xlu1 %v725_v60, %s592_s21  ;;  %425 = vrot.lane.b32.xlu0 %v696_v12, %s592_s21 }
  0x49   :  { %469 = vrot.lane.b32.xlu1 %v728_v61, %s593_s22  ;;  %467 = vrot.lane.b32.xlu0 %v704_v23, %s593_s22 }
  0x4d   :  { %473 = vrot.lane.b32.xlu1 %v725_v60, %s593_s22  ;;  %471 = vrot.lane.b32.xlu0 %v696_v12, %s593_s22 }
  0x95   :  { %v351_v62 = vpop.permute.xlu1 %350 }
  0x97   :  { %v347_v63 = vpop.permute.xlu0 %346 }
  0xa7   :  { %v353_v0 = vpop.permute.xlu1 %352  ;;  %v349_v2 = vpop.permute.xlu0 %348 }
  0xa8   :  { %v355_v3 = vsel %vm354_vm5, %v347_v63, %v349_v2  ;;  %v356_v37 = vsel %vm354_vm5, %v351_v62, %v353_v0  ;;  %v337_v62 = vmul.f32 0.25040448, %v728_v61 }
  0xa9   :  { %v359_v4 = vadd.f32 %v355_v3, %v704_v23  ;;  %v360_v42 = vadd.f32 %v356_v37, %v696_v12  ;;  %v339_v3 = vmul.f32 0.25040448, %v725_v60 }
  0xab   :  { %v361_v5 = vmul.f32 0.011002004, %v359_v4  ;;  %v378_v7 = vpop.permute.xlu1 %377  ;;  %v376_v9 = vpop.permute.xlu0 %375  ;;  %v362_v48 = vmul.f32 0.011002004, %v360_v42  ;;  %v338_v4 = vmul.f32 0.25040448, %v696_v12 }
  0xac   :  { %v391_v10 = vadd.f32 %v378_v7, %v728_v61  ;;  %v384_v20 = vsel %vm383_vm6, %v376_v9, %v378_v7 }
  0xad   :  { %v390_v11 = vadd.f32 %v384_v20, %v704_v23  ;;  %365 = vrot.lane.b32.xlu0 %v361_v5, %s594_s23 }
  0xae   :  { %v395_v14 = vmul.f32 0.043175146, %v391_v10 }
  0xaf   :  { %v394_v15 = vmul.f32 0.043175146, %v390_v11  ;;  %v382_v16 = vpop.permute.xlu1 %381  ;;  %v380_v22 = vpop.permute.xlu0 %379 }
  0xb0   :  { %v393_v24 = vadd.f32 %v382_v16, %v725_v60  ;;  %v385_v26 = vsel %vm383_vm6, %v380_v22, %v382_v16  ;;  %404 = vrot.lane.b32.xlu1 %v395_v14, %s595_s24 }
  0xb1   :  { %v392_v27 = vadd.f32 %v385_v26, %v696_v12  ;;  %402 = vrot.lane.b32.xlu0 %v394_v15, %s595_s24 }
  0xb2   :  { %v397_v28 = vmul.f32 0.043175146, %v393_v24 }
  0xb3   :  { %v396_v29 = vmul.f32 0.043175146, %v392_v27  ;;  %v424_v30 = vpop.permute.xlu1 %423  ;;  %v422_v21 = vpop.permute.xlu0 %421 }
  0xb4   :  { %v437_v18 = vadd.f32 %v424_v30, %v728_v61  ;;  %v430_v31 = vsel %vm429_vm7, %v422_v21, %v424_v30  ;;  %408 = vrot.lane.b32.xlu1 %v397_v28, %s595_s24 }
  0xb5   :  { %v436_v1 = vadd.f32 %v430_v31, %v704_v23  ;;  %406 = vrot.lane.b32.xlu0 %v396_v29, %s595_s24 }
  0xb6   :  { %v441_v36 = vmul.f32 0.11464352, %v437_v18 }
  0xb7   :  { %v440_v38 = vmul.f32 0.11464352, %v436_v1  ;;  %v428_v39 = vpop.permute.xlu1 %427  ;;  %v426_v40 = vpop.permute.xlu0 %425 }
  0xb8   :  { %v439_v34 = vadd.f32 %v428_v39, %v725_v60  ;;  %v431_v35 = vsel %vm429_vm7, %v426_v40, %v428_v39  ;;  %450 = vrot.lane.b32.xlu1 %v441_v36, %s596_s25 }
  0xb9   :  { %v438_v41 = vadd.f32 %v431_v35, %v696_v12  ;;  %448 = vrot.lane.b32.xlu0 %v440_v38, %s596_s25 }
  0xba   :  { %v443_v43 = vmul.f32 0.11464352, %v439_v34 }
  0xbb   :  { %v442_v44 = vmul.f32 0.11464352, %v438_v41  ;;  %v470_v8 = vpop.permute.xlu1 %469  ;;  %v468_v45 = vpop.permute.xlu0 %467 }
  0xbc   :  { %v483_v46 = vadd.f32 %v470_v8, %v728_v61  ;;  %v476_v13 = vsel %vm475_vm8, %v468_v45, %v470_v8  ;;  %454 = vrot.lane.b32.xlu1 %v443_v43, %s596_s25 }
  0xbd   :  { %v482_v47 = vadd.f32 %v476_v13, %v704_v23  ;;  %452 = vrot.lane.b32.xlu0 %v442_v44, %s596_s25 }
  0xbe   :  { %v487_v51 = vmul.f32 0.2059771, %v483_v46 }
  0xbf   :  { %v486_v25 = vmul.f32 0.2059771, %v482_v47  ;;  %v474_v49 = vpop.permute.xlu1 %473  ;;  %v472_v50 = vpop.permute.xlu0 %471 }
  0xc0   :  { %367 = vrot.lane.b32.xlu1 %v362_v48, %s594_s23  ;;  %v485_v52 = vadd.f32 %v474_v49, %v725_v60  ;;  %v477_v53 = vsel %vm475_vm8, %v472_v50, %v474_v49 }
  0xc1   :  { %v484_v54 = vadd.f32 %v477_v53, %v696_v12  ;;  %494 = vrot.lane.b32.xlu0 %v486_v25, %s597_s26 }
  0xc2   :  { %v489_v55 = vmul.f32 0.2059771, %v485_v52 }
  0xc3   :  { %v488_v33 = vmul.f32 0.2059771, %v484_v54 }
  0xc4   :  { %496 = vrot.lane.b32.xlu1 %v487_v51, %s597_s26 }
  0xc5   :  { %498 = vrot.lane.b32.xlu0 %v488_v33, %s597_s26 }
  0xc8   :  { %500 = vrot.lane.b32.xlu1 %v489_v55, %s597_s26 }
 0x11f   :  { %v366_v56 = vpop.permute.xlu0 %365 }
 0x120   :  { %v371_v63 = vadd.f32 %v366_v56, %v336_v58  ;;  %v372_v9 = vadd.f32 %v366_v56, %v337_v62 }
 0x122   :  { %v405_v6 = vpop.permute.xlu1 %404 }
 0x123   :  { %v403_v17 = vpop.permute.xlu0 %402 }
 0x124   :  { %v417_v5 = vadd.f32 %v403_v17, %v371_v63  ;;  %v411_v7 = vsel %vm410_vm9, %v403_v17, %v405_v6 }
 0x125   :  { %v418_v15 = vadd.f32 %v411_v7, %v372_v9 }
 0x126   :  { %v409_v32 = vpop.permute.xlu1 %408 }
 0x127   :  { %v407_v57 = vpop.permute.xlu0 %406 }
 0x128   :  { %v412_v22 = vsel %vm410_vm9, %v407_v57, %v409_v32 }
 0x12a   :  { %v451_v19 = vpop.permute.xlu1 %450 }
 0x12b   :  { %v449_v59 = vpop.permute.xlu0 %448 }
 0x12c   :  { %v463_v10 = vadd.f32 %v449_v59, %v417_v5  ;;  %v457_v23 = vsel %vm456_vm10, %v449_v59, %v451_v19 }
 0x12d   :  { %v464_v24 = vadd.f32 %v457_v23, %v418_v15 }
 0x12e   :  { %v455_v0 = vpop.permute.xlu1 %454 }
 0x12f   :  { %v453_v2 = vpop.permute.xlu0 %452 }
 0x130   :  { %v458_v21 = vsel %vm456_vm10, %v453_v2, %v455_v0 }
 0x132   :  { %v368_v20 = vpop.permute.xlu1 %367 }
 0x133   :  { %v373_v11 = vadd.f32 %v368_v20, %v338_v4  ;;  %v374_v14 = vadd.f32 %v368_v20, %v339_v3  ;;  %v495_v61 = vpop.permute.xlu0 %494 }
 0x134   :  { %v509_v16 = vadd.f32 %v495_v61, %v463_v10 }
 0x135   :  { %v419_v60 = vadd.f32 %v407_v57, %v373_v11  ;;  %v420_v12 = vadd.f32 %v412_v22, %v374_v14 }
 0x136   :  { %v497_v26 = vpop.permute.xlu1 %496  ;;  %517 = vrot.lane.b32.xlu0 %v509_v16, %s592_s21 }
 0x137   :  { %v503_v27 = vsel %vm502_vm11, %v495_v61, %v497_v26  ;;  %v465_v28 = vadd.f32 %v453_v2, %v419_v60  ;;  %v499_v29 = vpop.permute.xlu0 %498  ;;  %v466_v1 = vadd.f32 %v458_v21, %v420_v12 }
 0x138   :  { %v510_v30 = vadd.f32 %v503_v27, %v464_v24 }
 0x139   :  { %v511_v18 = vadd.f32 %v499_v29, %v465_v28 }
 0x13a   :  { %v501_v31 = vpop.permute.xlu1 %500  ;;  %519 = vrot.lane.b32.xlu1 %v510_v30, %s592_s21 }
 0x13b   :  { %v504_v36 = vsel %vm502_vm11, %v499_v29, %v501_v31  ;;  %521 = vrot.lane.b32.xlu0 %v511_v18, %s592_s21 }
 0x13c   :  { %v512_v37 = vadd.f32 %v504_v36, %v466_v1 }
 0x13e   :  { %523 = vrot.lane.b32.xlu1 %v512_v37, %s592_s21 }
 0x1a8   :  { %v518_v38 = vpop.permute.xlu0 %517 }
 0x1ac   :  { %v520_v39 = vpop.permute.xlu1 %519 }
 0x1ad   :  { %v525_v40 = vsel %vm429_vm7, %v518_v38, %v520_v39  ;;  %v522_v34 = vpop.permute.xlu0 %521 }
 0x1ae   :  { %529 = vst [vmem:[#allocation4] sm:$0xff] %v525_v40 }
 0x1b0   :  { %v524_v35 = vpop.permute.xlu1 %523 }
 0x1b1   :  { %v526_v41 = vsel %vm429_vm7, %v522_v34, %v524_v35 }
 0x1b2   :  { %530 = vst [vmem:[#allocation4 + $0x8] sm:$0xff] %v526_v41 }
 0x1b3   :  { %577 = shalt.err (!%p574_p4)
}
 0x1b4   :  { %s578_s4 = scalar_lea.hbm %s802_s2, 256 }
 0x1b5   :  { %p579_p5 = scmp.ne.s32.totalorder %s802_s2, %s578_s4  ;;  %p582_p6 = scmp.lt.u32.totalorder %s578_s4, %s802_s2 }
 0x1b7   :  { %p584_p7 = pnand %p582_p6, %p579_p5 }
 0x1b9   :  { %587 = shalt.err (!%p584_p7)
}
 0x1ba   :  { %s599_s9 = smov 128   ;;  %s600_s10 = smov 8  }
 0x1bb   :  { %542 = dma.vmem_to_hbm [thread:$0]  %s537_s28, 256, %s802_s2, [#allocation5], %s599_s9, %s599_s9, %s600_s10  }
 0x1bc   :  { %588 = dma.done.wait [#allocation5], 256  }
 0x1bd   :  { %589 = vsyncadd [#allocation5], 4294967040 }
 0x1be   :  { %546 = vsyncpa [#allocation5], 1 }

</bundles_post_ra>
